<compile_context>
chip_gen: v7x
topology: tpu7x:2x2x1
jax: 0.10.0
libtpu: 0.0.40
codegen_flags: <defaults>
</compile_context>

<pallas_src>
import jax
import jax.numpy as jnp
from jax import lax
from jax.experimental import pallas as pl
from jax.experimental.pallas import tpu as pltpu


def _classifier_kernel(x_ref, w_ref, b_ref, o_ref):
    # x_ref: (B, D) bf16 VMEM   (flattened activations)
    # w_ref: (O, D) bf16 VMEM   (PyTorch nn.Linear layout, rows contiguous)
    # b_ref: (O,)   f32  SMEM   (bias scalars)
    # o_ref: (B, O) f32  VMEM   (softmax probabilities)
    x = x_ref[...].astype(jnp.float32)          # exact f32 products/accumulation
    out_classes = o_ref.shape[1]

    # Per-class VPU multiply + XLU cross-lane reduce (static unroll, O = 2).
    # Avoids any MXU/N-padding and any hidden transpose of the (O, D) weight.
    cols = []
    for o in range(out_classes):
        w_row = w_ref[o, :].astype(jnp.float32)                 # (D,)
        col = jnp.sum(x * w_row, axis=-1, keepdims=True)        # (B, 1) f32
        cols.append(col + b_ref[o])                             # SMEM scalar bias
    logits = jnp.concatenate(cols, axis=-1)                     # (B, O) f32

    # Row-wise numerically-stable softmax (matches nn.Softmax(dim=1)).
    m = jnp.max(logits, axis=-1, keepdims=True)
    e = jnp.exp(logits - m)
    denom = jnp.sum(e, axis=-1, keepdims=True)
    # approx=False keeps full f32 precision for the tight reference tolerance.
    o_ref[...] = (e * pl.reciprocal(denom, approx=False)).astype(o_ref.dtype)

    # TODO(synk): if B grows large, pad the O axis to a lane-dense 128 in-kernel
    # (mask pads to -inf before max/exp, slice [:, :O] in the wrapper) to avoid
    # masked vst.msk partial stores on the 2-wide output.


@jax.jit
def drug_classifier_forward(features, weight, bias):
    """features: (B, ...) bf16 preferred; weight: (out_dim, in_dim) PyTorch layout; bias: (out_dim,) f32."""
    B = features.shape[0]
    x = features.reshape(B, -1)          # nn.Flatten(); no dtype cast here —
    # pass bf16 activations in; f32 is still correct, just doubles HBM traffic.
    O, D = weight.shape

    cost = pl.CostEstimate(
        flops=2 * B * D * O,
        bytes_accessed=(B * D * x.dtype.itemsize
                        + O * D * weight.dtype.itemsize
                        + O * bias.dtype.itemsize
                        + B * O * 4),
        transcendentals=B * O,
    )

    # Whole problem fits in VMEM -> single gridless invocation, full-array
    # blocks.  The kernel is launch/DMA-latency bound (~24 KiB total traffic).
    # TODO(synk): if batch grows, tile the batch axis with a "parallel" grid
    # dimension (sooner on v7x: 64 MiB VMEM, 2 TCs), keep the weight resident
    # via an index_map that always returns block (0, 0), and size
    # vmem_limit_bytes to (x tile + resident W + out tile) x buffering.
    return pl.pallas_call(
        _classifier_kernel,
        out_shape=jax.ShapeDtypeStruct((B, O), jnp.float32),
        in_specs=[
            pl.BlockSpec(memory_space=pltpu.MemorySpace.VMEM),   # x (B, D)
            pl.BlockSpec(memory_space=pltpu.MemorySpace.VMEM),   # weight (O, D)
            pl.BlockSpec(memory_space=pltpu.MemorySpace.SMEM),   # bias scalars
        ],
        out_specs=pl.BlockSpec(memory_space=pltpu.MemorySpace.VMEM),
        cost_estimate=cost,
    )(x, weight, bias)


def init_params(key, in_dim=2048, out_dim=2):
    # Mimics nn.Linear default init: U(-1/sqrt(in_dim), 1/sqrt(in_dim)).
    kw, kb = jax.random.split(key)
    bound = 1.0 / jnp.sqrt(jnp.float32(in_dim))
    # Keep PyTorch's (out_dim, in_dim) layout: rows are contiguous D-vectors,
    # giving dense DMA and a tiny VMEM footprint. Convert to bf16 once here.
    weight = jax.random.uniform(
        kw, (out_dim, in_dim), jnp.float32, -bound, bound
    ).astype(jnp.bfloat16)
    bias = jax.random.uniform(kb, (out_dim,), jnp.float32, -bound, bound)
    return weight, bias


if __name__ == "__main__":
    key = jax.random.PRNGKey(0)
    k_in, k_param = jax.random.split(key)

    in_dim, out_dim, batch = 2048, 2, 4
    # bf16 activations (cast once at creation, not in the forward wrapper).
    features = jax.random.normal(k_in, (batch, in_dim), jnp.float32).astype(jnp.bfloat16)
    weight, bias = init_params(k_param, in_dim=in_dim, out_dim=out_dim)

    probs = jax.block_until_ready(drug_classifier_forward(features, weight, bias))

    # Reference in plain JAX using the same bf16-rounded inputs (same math as
    # the PyTorch module).  HIGHEST precision so the tolerance isn't flaky.
    x32 = features.astype(jnp.float32).reshape(batch, -1)
    w32 = weight.astype(jnp.float32)
    ref_logits = jnp.dot(x32, w32.T, precision=lax.Precision.HIGHEST) + bias
    ref = jax.nn.softmax(ref_logits, axis=1)

    assert probs.shape == (batch, out_dim)
    assert jnp.allclose(probs, ref, atol=1e-4, rtol=1e-4)
    assert jnp.allclose(jnp.sum(probs, axis=1), 1.0, atol=1e-5)

    print("KERNEL_OK")
</pallas_src>

<mosaic_0001>
module attributes {stable_mosaic.version = 11 : i64} {
  func.func @_classifier_kernel(%arg0: memref<4x2048xbf16, #tpu.memory_space<vmem>>, %arg1: memref<2x2048xbf16, #tpu.memory_space<vmem>>, %arg2: memref<2xf32, #tpu.memory_space<smem>>, %arg3: memref<4x2xf32, #tpu.memory_space<vmem>>) attributes {dimension_semantics = [], scalar_prefetch = 0 : i64, scratch_operands = 0 : i64, tpu.core_type = #tpu.core_type<tc>} {
    %c0 = arith.constant 0 : index
    %c0_0 = arith.constant 0 : index
    %0 = vector.load %arg0[%c0, %c0_0] : memref<4x2048xbf16, #tpu.memory_space<vmem>>, vector<4x2048xbf16>
    %1 = arith.extf %0 : vector<4x2048xbf16> to vector<4x2048xf32>
    %c0_1 = arith.constant 0 : index
    %c0_2 = arith.constant 0 : index
    %2 = vector.load %arg1[%c0_1, %c0_2] : memref<2x2048xbf16, #tpu.memory_space<vmem>>, vector<1x2048xbf16>
    %3 = vector.shape_cast %2 : vector<1x2048xbf16> to vector<2048xbf16>
    %4 = arith.extf %3 : vector<2048xbf16> to vector<2048xf32>
    %5 = vector.shape_cast %4 : vector<2048xf32> to vector<1x2048xf32>
    %6 = vector.broadcast %5 : vector<1x2048xf32> to vector<4x2048xf32>
    %7 = arith.mulf %1, %6 : vector<4x2048xf32>
    %cst = arith.constant dense<0.000000e+00> : vector<4xf32>
    %8 = vector.multi_reduction <add>, %7, %cst [1] : vector<4x2048xf32> to vector<4xf32>
    %9 = vector.shape_cast %8 : vector<4xf32> to vector<4x1xf32>
    %c0_3 = arith.constant 0 : index
    %10 = memref.load %arg2[%c0_3] : memref<2xf32, #tpu.memory_space<smem>>
    %11 = vector.broadcast %10 : f32 to vector<4x1xf32>
    %12 = arith.addf %9, %11 : vector<4x1xf32>
    %c1 = arith.constant 1 : index
    %c0_4 = arith.constant 0 : index
    %13 = vector.load %arg1[%c1, %c0_4] : memref<2x2048xbf16, #tpu.memory_space<vmem>>, vector<1x2048xbf16>
    %14 = vector.shape_cast %13 : vector<1x2048xbf16> to vector<2048xbf16>
    %15 = arith.extf %14 : vector<2048xbf16> to vector<2048xf32>
    %16 = vector.shape_cast %15 : vector<2048xf32> to vector<1x2048xf32>
    %17 = vector.broadcast %16 : vector<1x2048xf32> to vector<4x2048xf32>
    %18 = arith.mulf %1, %17 : vector<4x2048xf32>
    %cst_5 = arith.constant dense<0.000000e+00> : vector<4xf32>
    %19 = vector.multi_reduction <add>, %18, %cst_5 [1] : vector<4x2048xf32> to vector<4xf32>
    %20 = vector.shape_cast %19 : vector<4xf32> to vector<4x1xf32>
    %c1_6 = arith.constant 1 : index
    %21 = memref.load %arg2[%c1_6] : memref<2xf32, #tpu.memory_space<smem>>
    %22 = vector.broadcast %21 : f32 to vector<4x1xf32>
    %23 = arith.addf %20, %22 : vector<4x1xf32>
    %24 = tpu.concatenate %12, %23 in 1 : vector<4x1xf32>, vector<4x1xf32> -> vector<4x2xf32>
    %cst_7 = arith.constant dense<0xFF800000> : vector<4xf32>
    %25 = vector.multi_reduction <maximumf>, %24, %cst_7 [1] : vector<4x2xf32> to vector<4xf32>
    %26 = vector.shape_cast %25 : vector<4xf32> to vector<4x1xf32>
    %27 = vector.broadcast %26 : vector<4x1xf32> to vector<4x2xf32>
    %28 = arith.subf %24, %27 : vector<4x2xf32>
    %29 = math.exp %28 : vector<4x2xf32>
    %cst_8 = arith.constant dense<0.000000e+00> : vector<4xf32>
    %30 = vector.multi_reduction <add>, %29, %cst_8 [1] : vector<4x2xf32> to vector<4xf32>
    %31 = vector.shape_cast %30 : vector<4xf32> to vector<4x1xf32>
    %32 = tpu.reciprocal %31 : vector<4x1xf32> -> vector<4x1xf32>
    %33 = vector.broadcast %32 : vector<4x1xf32> to vector<4x2xf32>
    %34 = arith.mulf %29, %33 : vector<4x2xf32>
    %c0_9 = arith.constant 0 : index
    %c0_10 = arith.constant 0 : index
    %35 = vector.load %arg3[%c0_9, %c0_10] : memref<4x2xf32, #tpu.memory_space<vmem>>, vector<4x2xf32>
    tpu.vector_store %arg3[%c0_9, %c0_10], %34 {strides = array<i32>} : memref<4x2xf32, #tpu.memory_space<vmem>>, vector<4x2xf32>,
    return
  }
}

</mosaic_0001>

<bundles_post_ra>
// kernel: drug_classifier_forward.1
= control target key start
LH: loop header
LB: loop body
LE: loop exit
PB: predicated region body
PF: predicated region fallthrough
CT: control target
= control target key end

     0   :  { %8 = vsyncpa [#allocation3], 0  ;;  %s927_s0 = inlined_call_operand.hbm [shape: bf16[4,2048], index: 0, kind: input, shape index: {}]   ;;  %s928_s1 = inlined_call_operand.hbm [shape: bf16[2,2048], index: 1, kind: input, shape index: {}]   ;;  %s929_s2 = inlined_call_operand.vmem [shape: f32[2], index: 2, kind: input, shape index: {}]   ;;  %s930_s3 = inlined_call_operand.vmem [shape: f32[4,2], index: 3, kind: output, shape index: {}]  }
   0x1   :  { %9 = vsyncpa [#allocation6], 0 }
   0x2   :  { %10 = vsyncpa [#allocation4], 0  ;;  %s664_s12 = smov [#allocation2]   ;;  %s665_s14 = smov [#allocation5]  }
   0x3   :  { %s17_s13 = sshll.u32 %s664_s12, 4  ;;  %s27_s15 = sshll.u32 %s665_s14, 4  ;;  %s18_s13 = int_to_ptr.vmem [resolvable:$true] %s17_s13  ;;  %s28_s15 = int_to_ptr.vmem [resolvable:$true] %s27_s15 }
   0x4   :  { %s602_s18 = scalar_lea.hbm %s927_s0, 512 }
   0x5   :  { %p603_p0 = scmp.ne.s32.totalorder %s927_s0, %s602_s18  ;;  %p606_p1 = scmp.lt.u32.totalorder %s602_s18, %s927_s0 }
   0x7   :  { %p608_p2 = pnand %p606_p1, %p603_p0 }
   0x9   :  { %611 = shalt.err (!%p608_p2)
}
   0xa   :  { %s612_s23 = scalar_lea.vmem %s18_s13, 512  ;;  %p617_p4 = scmp.lt.s32.totalorder %s18_s13, %s18_s13 }
   0xb   :  { %p613_p3 = scmp.ne.s32.totalorder %s18_s13, %s612_s23  ;;  %p618_p5 = scmp.lt.s32.totalorder %s612_s23, %s612_s23 }
   0xd   :  { %p619_p6 = por %p618_p5, %p617_p4 }
   0xf   :  { %p620_p7 = pnand %p619_p6, %p613_p3 }
  0x11   :  { %623 = shalt.err (!%p620_p7)
}
  0x12   :  { %20 = dma.hbm_to_vmem [thread:$0]  %s927_s0, 512, %s18_s13, [#allocation3]  }
  0x13   :  { %s624_s28 = scalar_lea.hbm %s928_s1, 256 }
  0x14   :  { %p625_p8 = scmp.ne.s32.totalorder %s928_s1, %s624_s28  ;;  %p628_p9 = scmp.lt.u32.totalorder %s624_s28, %s928_s1 }
  0x16   :  { %p630_p10 = pnand %p628_p9, %p625_p8 }
  0x18   :  { %633 = shalt.err (!%p630_p10)
}
  0x19   :  { %s634_s6 = scalar_lea.vmem %s28_s15, 256  ;;  %p639_p12 = scmp.lt.s32.totalorder %s28_s15, %s28_s15 }
  0x1a   :  { %p635_p11 = scmp.ne.s32.totalorder %s28_s15, %s634_s6  ;;  %p640_p13 = scmp.lt.s32.totalorder %s634_s6, %s634_s6 }
  0x1c   :  { %p641_p0 = por %p640_p13, %p639_p12 }
  0x1e   :  { %p642_p1 = pnand %p641_p0, %p635_p11 }
  0x20   :  { %645 = shalt.err (!%p642_p1)
}
  0x21   :  { %30 = dma.hbm_to_vmem [thread:$0]  %s928_s1, 256, %s28_s15, [#allocation6]  }
  0x22   :  { %s37_s10 = sshll.u32 %s929_s2, 4  ;;  %s38_s10 = int_to_ptr.vmem [resolvable:$true] %s37_s10 }
  0x23   :  { %s646_s11 = scalar_lea.vmem %s38_s10, 16  ;;  %p651_p3 = scmp.lt.s32.totalorder %s38_s10, %s38_s10 }
  0x24   :  { %p647_p2 = scmp.ne.s32.totalorder %s38_s10, %s646_s11  ;;  %p652_p4 = scmp.lt.s32.totalorder %s646_s11, %s646_s11 }
  0x26   :  { %p653_p5 = por %p652_p4, %p651_p3 }
  0x28   :  { %p654_p6 = pnand %p653_p5, %p647_p2 }
  0x2a   :  { %657 = shalt.err (!%p654_p6)
}
  0x2b   :  { %s666_s12 = smov [#allocation7]  }
  0x2c   :  { %40 = dma.vmem_to_smem %s38_s10, 16, %s666_s12, [#allocation4]  }
  0x2d   :  { %658 = dma.done.wait [#allocation3], 512  }
  0x2e   :  { %659 = vsyncadd [#allocation3], 4294966784 }
  0x2f   :  { %660 = dma.done.wait [#allocation6], 256  }
  0x30   :  { %661 = vsyncadd [#allocation6], 4294967040 }
  0x31   :  { %662 = dma.done.wait [#allocation4], 16  }
  0x32   :  { %663 = vsyncadd [#allocation4], 4294967280 }
  0x33   :  { %50 = sfence }
  0x34   :  { %v73_v0 = vlaneseq  ;;  %v63_v1 = vld [vmem:[#allocation5] sm:$0xff]  ;;  %v64_v5 = vld [vmem:[#allocation5 + $0x8] sm:$0xff]  ;;  %v758_v25 = vld [vmem:[#allocation2 + $0x10] sm:$0xff]  ;;  %vm281_vm0 = vcmask 1043456   ;;  %s315_s1 = sld [smem:[#allocation7]]  ;;  %s594_s2 = sld [smem:[#allocation7 + $0x1]] }
  0x35   :  { %v714_v2 = vunpack.c.l.bf16 %v63_v1  ;;  %v718_v4 = vunpack.c.h.bf16 %v63_v1  ;;  %v740_v14 = vunpack.c.l.bf16 %v64_v5  ;;  %v750_v19 = vld [vmem:[#allocation2] sm:$0xff]  ;;  %v752_v20 = vld [vmem:[#allocation2 + $0x8] sm:$0xff]  ;;  %v772_v36 = vunpack.c.h.bf16 %v64_v5  ;;  %v774_v37 = vld [vmem:[#allocation2 + $0x18] sm:$0xff] }
  0x36   :  { %v716_v3 = vshrl.u32 %v73_v0, 7  ;;  %v55_v30 = vunpack.c.l.bf16 %v750_v19  ;;  %v56_v31 = vunpack.c.h.bf16 %v750_v19  ;;  %v57_v34 = vunpack.c.l.bf16 %v752_v20 }
  0x37   :  { %v58_v35 = vunpack.c.h.bf16 %v752_v20  ;;  %v59_v38 = vunpack.c.l.bf16 %v758_v25  ;;  %v60_v46 = vunpack.c.h.bf16 %v758_v25  ;;  %v61_v50 = vunpack.c.l.bf16 %v774_v37 }
  0x38   :  { %v721_v6 = vsub.s32 0, %v716_v3  ;;  %v724_v7 = vsub.s32 2, %v716_v3  ;;  %v727_v8 = vsub.s32 4, %v716_v3  ;;  %v730_v9 = vsub.s32 6, %v716_v3 }
  0x39   :  { %v794_v53 = vsub.s32 1, %v716_v3  ;;  %vm572_vm1 = vcmask 7168   ;;  %vm574_vm2 = vcmask 11264  }
  0x3a   :  { %v76_v10 = vrot.slane %v714_v2, %v721_v6  ;;  %v80_v11 = vrot.slane %v714_v2, %v724_v7  ;;  %v84_v12 = vrot.slane %v714_v2, %v727_v8  ;;  %v88_v13 = vrot.slane %v714_v2, %v730_v9 }
  0x3b   :  { %v92_v15 = vrot.slane %v718_v4, %v721_v6  ;;  %v96_v16 = vrot.slane %v718_v4, %v724_v7  ;;  %v100_v17 = vrot.slane %v718_v4, %v727_v8  ;;  %v104_v18 = vrot.slane %v718_v4, %v730_v9 }
  0x3c   :  { %v156_v21 = vrot.slane %v76_v10, %v721_v6  ;;  %v160_v22 = vrot.slane %v80_v11, %v721_v6  ;;  %v164_v23 = vrot.slane %v84_v12, %v721_v6  ;;  %v168_v24 = vrot.slane %v88_v13, %v721_v6 }
  0x3d   :  { %v108_v26 = vrot.slane %v740_v14, %v721_v6  ;;  %v112_v27 = vrot.slane %v740_v14, %v724_v7  ;;  %v172_v28 = vrot.slane %v92_v15, %v721_v6  ;;  %v176_v29 = vrot.slane %v96_v16, %v721_v6 }
  0x3e   :  { %v180_v32 = vrot.slane %v100_v17, %v721_v6  ;;  %v184_v33 = vrot.slane %v104_v18, %v721_v6  ;;  %v233_v39 = vcombine.low %v156_v21, %v160_v22  ;;  %v234_v40 = vcombine.low %v164_v23, %v168_v24 }
  0x3f   :  { %v235_v41 = vcombine.low %v172_v28, %v176_v29  ;;  %v116_v42 = vrot.slane %v740_v14, %v727_v8  ;;  %v120_v43 = vrot.slane %v740_v14, %v730_v9  ;;  %v188_v44 = vrot.slane %v108_v26, %v721_v6 }
  0x40   :  { %v192_v45 = vrot.slane %v112_v27, %v721_v6  ;;  %v236_v47 = vcombine.low %v180_v32, %v184_v33  ;;  %v249_v48 = vmul.f32 %v233_v39, %v55_v30  ;;  %v250_v49 = vmul.f32 %v234_v40, %v56_v31 }
  0x41   :  { %v124_v51 = vrot.slane %v772_v36, %v721_v6  ;;  %v251_v52 = vmul.f32 %v235_v41, %v57_v34  ;;  %v128_v54 = vrot.slane %v772_v36, %v724_v7  ;;  %v132_v55 = vrot.slane %v772_v36, %v727_v8 }
  0x42   :  { %v265_v56 = vcombine.high %v249_v48, %v249_v48  ;;  %v266_v57 = vcombine.high %v250_v49, %v250_v49  ;;  %v136_v58 = vrot.slane %v772_v36, %v730_v9  ;;  %v196_v59 = vrot.slane %v116_v42, %v721_v6 }
  0x43   :  { %v200_v60 = vrot.slane %v120_v43, %v721_v6  ;;  %v237_v61 = vcombine.low %v188_v44, %v192_v45  ;;  %v252_v62 = vmul.f32 %v236_v47, %v58_v35  ;;  %v282_v63 = vsel %vm281_vm0, %v249_v48, 0.0 }
  0x44   :  { %v283_v0 = vsel %vm281_vm0, %v265_v56, 0.0  ;;  %v285_v1 = vsel %vm281_vm0, %v250_v49, 0.0  ;;  %v267_v5 = vcombine.high %v251_v52, %v251_v52  ;;  %v810_v8 = vsub.s32 3, %v716_v3 }
  0x45   :  { %v284_v7 = vadd.f32 %v283_v0, %v282_v63  ;;  %v813_v9 = vsub.s32 5, %v716_v3  ;;  %v204_v10 = vrot.slane %v124_v51, %v721_v6  ;;  %v208_v11 = vrot.slane %v128_v54, %v721_v6 }
  0x46   :  { %v287_v12 = vsel %vm281_vm0, %v266_v57, 0.0  ;;  %v819_v13 = vsub.s32 7, %v716_v3  ;;  %v212_v15 = vrot.slane %v132_v55, %v721_v6  ;;  %v216_v16 = vrot.slane %v136_v58, %v721_v6 }
  0x47   :  { %v238_v17 = vcombine.low %v196_v59, %v200_v60  ;;  %v286_v18 = vadd.f32 %v285_v1, %v284_v7  ;;  %v62_v21 = vunpack.c.h.bf16 %v774_v37  ;;  %v253_v22 = vmul.f32 %v237_v61, %v59_v38 }
  0x48   :  { %v268_v23 = vcombine.high %v252_v62, %v252_v62  ;;  %v289_v24 = vsel %vm281_vm0, %v251_v52, 0.0  ;;  %v291_v27 = vsel %vm281_vm0, %v267_v5, 0.0  ;;  %v331_v3 = vrot.slane %v714_v2, %v794_v53 }
  0x49   :  { %v288_v26 = vadd.f32 %v287_v12, %v286_v18  ;;  %v335_v28 = vrot.slane %v714_v2, %v810_v8  ;;  %v339_v6 = vrot.slane %v714_v2, %v813_v9  ;;  %v343_v29 = vrot.slane %v714_v2, %v819_v13 }
  0x4a   :  { %v347_v32 = vrot.slane %v718_v4, %v794_v53  ;;  %v351_v33 = vrot.slane %v718_v4, %v810_v8  ;;  %v239_v39 = vcombine.low %v204_v10, %v208_v11  ;;  %v240_v40 = vcombine.low %v212_v15, %v216_v16 }
  0x4b   :  { %v254_v41 = vmul.f32 %v238_v17, %v60_v46  ;;  %v290_v42 = vadd.f32 %v289_v24, %v288_v26  ;;  %v269_v43 = vcombine.high %v253_v22, %v253_v22  ;;  %v293_v44 = vsel %vm281_vm0, %v252_v62, 0.0 }
  0x4c   :  { %v295_v45 = vsel %vm281_vm0, %v268_v23, 0.0  ;;  %v355_v2 = vrot.slane %v718_v4, %v813_v9  ;;  %v359_v48 = vrot.slane %v718_v4, %v819_v13  ;;  %v411_v49 = vrot.slane %v331_v3, %v794_v53 }
  0x4d   :  { %v292_v47 = vadd.f32 %v291_v27, %v290_v42  ;;  %v415_v51 = vrot.slane %v335_v28, %v794_v53  ;;  %v419_v52 = vrot.slane %v339_v6, %v794_v53  ;;  %v423_v54 = vrot.slane %v343_v29, %v794_v53 }
  0x4e   :  { %v427_v55 = vrot.slane %v347_v32, %v794_v53  ;;  %v431_v56 = vrot.slane %v351_v33, %v794_v53  ;;  %v255_v57 = vmul.f32 %v239_v39, %v61_v50  ;;  %v256_v58 = vmul.f32 %v240_v40, %v62_v21 }
  0x4f   :  { %v294_v59 = vadd.f32 %v293_v44, %v292_v47  ;;  %v270_v4 = vcombine.high %v254_v41, %v254_v41  ;;  %v297_v60 = vsel %vm281_vm0, %v253_v22, 0.0  ;;  %v299_v61 = vsel %vm281_vm0, %v269_v43, 0.0 }
  0x50   :  { %v363_v63 = vrot.slane %v740_v14, %v794_v53  ;;  %v367_v0 = vrot.slane %v740_v14, %v810_v8  ;;  %v488_v1 = vcombine.low %v411_v49, %v415_v51  ;;  %v435_v5 = vrot.slane %v355_v2, %v794_v53 }
  0x51   :  { %v296_v62 = vadd.f32 %v295_v45, %v294_v59  ;;  %v439_v7 = vrot.slane %v359_v48, %v794_v53  ;;  %v489_v10 = vcombine.low %v419_v52, %v423_v54  ;;  %v490_v11 = vcombine.low %v427_v55, %v431_v56 }
  0x52   :  { %v271_v12 = vcombine.high %v255_v57, %v255_v57  ;;  %v272_v15 = vcombine.high %v256_v58, %v256_v58  ;;  %v301_v17 = vsel %vm281_vm0, %v254_v41, 0.0  ;;  %v303_v18 = vsel %vm281_vm0, %v270_v4, 0.0 }
  0x53   :  { %v298_v16 = vadd.f32 %v297_v60, %v296_v62  ;;  %v371_v22 = vrot.slane %v740_v14, %v813_v9  ;;  %v504_v23 = vmul.f32 %v488_v1, %v55_v30  ;;  %v505_v24 = vmul.f32 %v489_v10, %v56_v31 }
  0x54   :  { %v375_v27 = vrot.slane %v740_v14, %v819_v13  ;;  %v443_v3 = vrot.slane %v363_v63, %v794_v53  ;;  %v447_v28 = vrot.slane %v367_v0, %v794_v53  ;;  %v491_v6 = vcombine.low %v435_v5, %v439_v7 }
  0x55   :  { %v300_v26 = vadd.f32 %v299_v61, %v298_v16  ;;  %v506_v29 = vmul.f32 %v490_v11, %v57_v34  ;;  %v520_v32 = vcombine.high %v504_v23, %v504_v23  ;;  %v521_v33 = vcombine.high %v505_v24, %v505_v24 }
  0x56   :  { %v305_v30 = vsel %vm281_vm0, %v255_v57, 0.0  ;;  %v307_v19 = vsel %vm281_vm0, %v271_v12, 0.0  ;;  %v379_v31 = vrot.slane %v772_v36, %v794_v53  ;;  %v383_v14 = vrot.slane %v772_v36, %v810_v8 }
  0x57   :  { %v302_v39 = vadd.f32 %v301_v17, %v300_v26  ;;  %v451_v40 = vrot.slane %v371_v22, %v794_v53  ;;  %v536_v41 = vsel %vm281_vm0, %v504_v23, 0.0  ;;  %v537_v42 = vsel %vm281_vm0, %v520_v32, 0.0 }
  0x58   :  { %v455_v43 = vrot.slane %v375_v27, %v794_v53  ;;  %v538_v44 = vadd.f32 %v537_v42, %v536_v41  ;;  %v539_v45 = vsel %vm281_vm0, %v505_v24, 0.0  ;;  %v492_v2 = vcombine.low %v443_v3, %v447_v28 }
  0x59   :  { %v304_v34 = vadd.f32 %v303_v18, %v302_v39  ;;  %v507_v47 = vmul.f32 %v491_v6, %v58_v35  ;;  %v522_v48 = vcombine.high %v506_v29, %v506_v29  ;;  %v541_v49 = vsel %vm281_vm0, %v521_v33, 0.0 }
  0x5a   :  { %v309_v51 = vsel %vm281_vm0, %v256_v58, 0.0  ;;  %v540_v52 = vadd.f32 %v539_v45, %v538_v44  ;;  %v311_v54 = vsel %vm281_vm0, %v272_v15, 0.0  ;;  %v387_v55 = vrot.slane %v772_v36, %v813_v9 }
  0x5b   :  { %v306_v8 = vadd.f32 %v305_v30, %v304_v34  ;;  %v391_v56 = vrot.slane %v772_v36, %v819_v13  ;;  %v543_v57 = vsel %vm281_vm0, %v506_v29, 0.0  ;;  %v459_v20 = vrot.slane %v379_v31, %v794_v53 }
  0x5c   :  { %v463_v35 = vrot.slane %v383_v14, %v794_v53  ;;  %v542_v4 = vadd.f32 %v541_v49, %v540_v52  ;;  %v493_v60 = vcombine.low %v451_v40, %v455_v43  ;;  %v508_v58 = vmul.f32 %v492_v2, %v59_v38 }
  0x5d   :  { %v308_v59 = vadd.f32 %v307_v19, %v306_v8  ;;  %v523_v61 = vcombine.high %v507_v47, %v507_v47  ;;  %v545_v62 = vsel %vm281_vm0, %v522_v48, 0.0  ;;  %v547_v0 = vsel %vm281_vm0, %v507_v47, 0.0 }
  0x5e   :  { %v544_v9 = vadd.f32 %v543_v57, %v542_v4  ;;  %v467_v13 = vrot.slane %v387_v55, %v794_v53  ;;  %v471_v1 = vrot.slane %v391_v56, %v794_v53  ;;  %v494_v7 = vcombine.low %v459_v20, %v463_v35 }
  0x5f   :  { %v310_v63 = vadd.f32 %v309_v51, %v308_v59  ;;  %v509_v10 = vmul.f32 %v493_v60, %v60_v46  ;;  %v524_v11 = vcombine.high %v508_v58, %v508_v58  ;;  %v549_v38 = vsel %vm281_vm0, %v523_v61, 0.0 }
  0x60   :  { %v546_v5 = vadd.f32 %v545_v62, %v544_v9  ;;  %v551_v15 = vsel %vm281_vm0, %v508_v58, 0.0  ;;  %v495_v17 = vcombine.low %v467_v13, %v471_v1  ;;  %v510_v18 = vmul.f32 %v494_v7, %v61_v50 }
  0x61   :  { %v312_v36 = vadd.f32 %v311_v54, %v310_v63  ;;  %v525_v22 = vcombine.high %v509_v10, %v509_v10  ;;  %v553_v53 = vsel %vm281_vm0, %v524_v11, 0.0  ;;  %v555_v24 = vsel %vm281_vm0, %v509_v10, 0.0 }
  0x62   :  { %v548_v12 = vadd.f32 %v547_v0, %v546_v5  ;;  %v511_v46 = vmul.f32 %v495_v17, %v62_v21  ;;  %v526_v26 = vcombine.high %v510_v18, %v510_v18  ;;  %v559_v28 = vsel %vm281_vm0, %v510_v18, 0.0 }
  0x63   :  { %313 = vadd.xlane.f32.xlu0 %v312_v36  ;;  %v557_v27 = vsel %vm281_vm0, %v525_v22, 0.0  ;;  %v316_v21 = vstv %s315_s1  ;;  %v570_v14 = vstv %s594_s2 }
  0x64   :  { %v550_v16 = vadd.f32 %v549_v38, %v548_v12  ;;  %v527_v29 = vcombine.high %v511_v46, %v511_v46  ;;  %v561_v50 = vsel %vm281_vm0, %v526_v26, 0.0  ;;  %v563_v33 = vsel %vm281_vm0, %v511_v46, 0.0 }
  0x66   :  { %v552_v23 = vadd.f32 %v551_v15, %v550_v16  ;;  %v565_v30 = vsel %vm281_vm0, %v527_v29, 0.0 }
  0x68   :  { %v554_v25 = vadd.f32 %v553_v53, %v552_v23 }
  0x6a   :  { %v556_v3 = vadd.f32 %v555_v24, %v554_v25 }
  0x6c   :  { %v558_v6 = vadd.f32 %v557_v27, %v556_v3 }
  0x6e   :  { %v560_v32 = vadd.f32 %v559_v28, %v558_v6 }
  0x70   :  { %v562_v39 = vadd.f32 %v561_v50, %v560_v32 }
  0x72   :  { %v564_v19 = vadd.f32 %v563_v33, %v562_v39 }
  0x74   :  { %v566_v31 = vadd.f32 %v565_v30, %v564_v19 }
  0x76   :  { %567 = vadd.xlane.f32.xlu0 %v566_v31 }
  0xf0   :  { %v314_v37 = vpop.xlane.xlu0 %313 }
  0xf1   :  { %v317_v41 = vadd.f32 %v316_v21, %v314_v37 }
 0x103   :  { %v568_v40 = vpop.xlane.xlu0 %567 }
 0x104   :  { %v571_v42 = vadd.f32 %v570_v14, %v568_v40 }
 0x106   :  { %v573_v34 = vsel %vm572_vm1, %v317_v41, %v571_v42 }
 0x107   :  { %v575_v43 = vsel %vm574_vm2, %v573_v34, -inf }
 0x108   :  { %576 = vmax.xlane.f32.xlu1 %v575_v43 }
 0x195   :  { %v577_v44 = vpop.xlane.xlu1 %576 }
 0x196   :  { %v578_v45 = vsub.f32 %v573_v34, %v577_v44 }
 0x198   :  { %v579_v2 = vmul.f32 1.442695, %v578_v45 }
 0x19a   :  { %598 = vpow2.f32 %v579_v2 }
 0x1a4   :  { %v599_v47 = vpop.eup %598 }
 0x1a5   :  { %v581_v48 = vsel %vm574_vm2, %v599_v47, 0.0 }
 0x1a6   :  { %582 = vadd.xlane.f32.xlu1 %v581_v48 }
 0x233   :  { %v583_v49 = vpop.xlane.xlu1 %582 }
 0x234   :  { %600 = vrcp.f32 %v583_v49 }
 0x23e   :  { %v601_v8 = vpop.eup %600 }
 0x23f   :  { %v585_v51 = vmul.f32 %v601_v8, %v599_v47 }
 0x241   :  { %586 = vst.msk [vmem:[%s930_s3] sm:$0xf] %vm574_vm2, %v585_v51 }
 0x242   :  { %591 = vsyncpa [#allocation3], 1 }
 0x243   :  { %592 = vsyncpa [#allocation6], 1 }
 0x244   :  { %593 = vsyncpa [#allocation4], 1 }

</bundles_post_ra>
